<compile_context>
chip_gen: v5e
topology: v5e:2x2
jax: 0.10.0
libtpu: 0.0.40
codegen_flags: <defaults>
</compile_context>

<pallas_src>
import jax
import jax.numpy as jnp
from jax.experimental import pallas as pl
from jax.experimental.pallas import tpu as pltpu


# ---------------------------------------------------------------------------
# Fused kernel: gather TILE_B*L embedding rows (in-VMEM), then one Linear.
# ---------------------------------------------------------------------------
def _emb_linear_kernel(ids_ref,   # SMEM, (Bp*L,) int32  (scalar prefetch)
                       emb_ref,   # VMEM, (V, E)         whole table, resident
                       w_ref,     # VMEM, (E, H)         pre-transposed weight
                       b_ref,     # VMEM, (1, H)         bias
                       o_ref,     # VMEM, (M, H)         output rows this step
                       gath):     # VMEM scratch, (M, E) gathered rows
    m = gath.shape[0]                      # rows (= TILE_B * L) per grid step
    base = pl.program_id(0) * m            # first flat token index this step

    # In-VMEM gather: dynamic row reads from the resident table into a
    # contiguous scratch.  No DMAs, no semaphores.  m is a small trace-time
    # constant here, so a static unroll is fine (switch to lax.fori_loop for
    # very long sequences).
    for r in range(m):
        tok = ids_ref[base + r]
        gath[pl.ds(r, 1), :] = emb_ref[pl.ds(tok, 1), :]

    # Single (M, E) @ (E, H) MXU matmul + bias, native dtypes, f32 accumulate.
    out = jnp.dot(gath[...], w_ref[...], preferred_element_type=jnp.float32)
    o_ref[...] = (out + b_ref[...]).astype(o_ref.dtype)


# ---------------------------------------------------------------------------
# Wrapper
# ---------------------------------------------------------------------------
def qus_embedding_map(qus, emb_table, lin_w, lin_b, *, rows_per_step=256):
    """qus: (B, L) int token ids; emb_table: (V, E);
    lin_w: (H, E) (PyTorch nn.Linear layout); lin_b: (H,).
    Returns (B, L, H) float32."""
    B, L = qus.shape
    V, E = emb_table.shape
    H = lin_w.shape[0]

    # Fold batch into the matmul M dimension: TILE_B batch items per grid
    # step -> M = TILE_B*L rows per matmul (target rows_per_step), but keep
    # at least 2 parallel grid steps when B >= 2 so v7x's two TensorCores
    # both stay busy.
    tile_b = max(1, min(B, rows_per_step // max(L, 1)))
    num_steps = -(-B // tile_b)
    if num_steps < 2 and B >= 2:
        num_steps = 2
        tile_b = -(-B // num_steps)
        num_steps = -(-B // tile_b)
    Bp = num_steps * tile_b                 # padded batch (if B % tile_b != 0)
    M = tile_b * L                          # matmul rows per grid step

    # Flat 1-D ids for tight SMEM padding; pad with id 0 for padded batch rows.
    ids = qus.astype(jnp.int32).reshape(-1)
    if Bp != B:
        ids = jnp.pad(ids, (0, Bp * L - ids.shape[0]))

    w_t = jnp.transpose(lin_w)              # (E, H): transpose once, trace time
    bias = lin_b.reshape(1, H)

    out_flat = pl.pallas_call(
        _emb_linear_kernel,
        out_shape=jax.ShapeDtypeStruct((Bp * L, H), jnp.float32),
        grid_spec=pltpu.PrefetchScalarGridSpec(
            num_scalar_prefetch=1,                              # ids -> SMEM
            grid=(num_steps,),
            in_specs=[
                pl.BlockSpec((V, E), lambda i, ids: (0, 0)),    # table (VMEM, invariant)
                pl.BlockSpec((E, H), lambda i, ids: (0, 0)),    # W^T   (invariant)
                pl.BlockSpec((1, H), lambda i, ids: (0, 0)),    # bias  (invariant)
            ],
            out_specs=pl.BlockSpec((M, H), lambda i, ids: (i, 0)),
            scratch_shapes=[
                pltpu.VMEM((M, E), emb_table.dtype),            # gathered rows
            ],
        ),
        compiler_params=pltpu.CompilerParams(
            dimension_semantics=("parallel",)),                 # 2-TC split on v7x
    )(ids, emb_table, w_t, bias)

    return out_flat[: B * L].reshape(B, L, H)


# ---------------------------------------------------------------------------
# Pure-JAX reference (correctness check only)
# ---------------------------------------------------------------------------
def reference(qus, emb_table, lin_w, lin_b):
    return emb_table[qus] @ lin_w.T + lin_b


if __name__ == "__main__":
    # Small shapes consistent with the module: batch=2, seq=8, vocab=256,
    # embedding_dim=64, hidden_size=128 (lane-dense output).
    B, L, V, E, H = 2, 8, 256, 64, 128
    ks = jax.random.split(jax.random.PRNGKey(0), 4)
    qus = jax.random.randint(ks[0], (B, L), 0, V, dtype=jnp.int32)
    emb = jax.random.normal(ks[1], (V, E), jnp.float32)
    lin_w = 0.1 * jax.random.normal(ks[2], (H, E), jnp.float32)
    lin_b = 0.1 * jax.random.normal(ks[3], (H,), jnp.float32)

    out = jax.block_until_ready(qus_embedding_map(qus, emb, lin_w, lin_b))
    ref = jax.block_until_ready(reference(qus, emb, lin_w, lin_b))

    assert out.shape == (B, L, H)
    err = float(jnp.max(jnp.abs(out - ref)))
    assert jnp.allclose(out, ref, atol=1e-4, rtol=1e-4), f"max abs err = {err}"
    # GloVe init (init_embedding from file) is construction-time weight
    # loading, not a forward op; dropout p=0.0 is identity — both omitted.
    print("KERNEL_OK")
</pallas_src>

<mosaic_0001>
module attributes {stable_mosaic.version = 11 : i64} {
  func.func @_emb_linear_kernel(%arg0: i32, %arg1: memref<16xi32, #tpu.memory_space<smem>>, %arg2: memref<256x64xf32, #tpu.memory_space<vmem>>, %arg3: memref<64x128xf32, #tpu.memory_space<vmem>>, %arg4: memref<1x128xf32, #tpu.memory_space<vmem>>, %arg5: memref<8x128xf32, #tpu.memory_space<vmem>>, %arg6: memref<8x64xf32, #tpu.memory_space<vmem>>) attributes {dimension_semantics = [#tpu.dimension_semantics<parallel>], iteration_bounds = array<i64: 2>, scalar_prefetch = 1 : i64, scratch_operands = 1 : i64, tpu.core_type = #tpu.core_type<tc>, window_params = [{pipeline_mode = #tpu.pipeline_mode<synchronous>, transform_indices = @transform_0, window_bounds = array<i64: 256, 64>}, {pipeline_mode = #tpu.pipeline_mode<synchronous>, transform_indices = @transform_1, window_bounds = array<i64: 64, 128>}, {pipeline_mode = #tpu.pipeline_mode<synchronous>, transform_indices = @transform_2, window_bounds = array<i64: 1, 128>}, {transform_indices = @transform_3, window_bounds = array<i64: 8, 128>}]} {
    %c8_i32 = arith.constant 8 : i32
    %0 = arith.muli %arg0, %c8_i32 : i32
    %c0_i32 = arith.constant 0 : i32
    %1 = arith.addi %0, %c0_i32 : i32
    %2 = arith.index_cast %1 : i32 to index
    %3 = memref.load %arg1[%2] : memref<16xi32, #tpu.memory_space<smem>>
    %4 = arith.index_cast %3 : i32 to index
    %c0 = arith.constant 0 : index
    %5 = vector.load %arg2[%4, %c0] : memref<256x64xf32, #tpu.memory_space<vmem>>, vector<1x64xf32>
    %c0_0 = arith.constant 0 : index
    %c0_1 = arith.constant 0 : index
    %6 = vector.load %arg6[%c0_0, %c0_1] : memref<8x64xf32, #tpu.memory_space<vmem>>, vector<1x64xf32>
    tpu.vector_store %arg6[%c0_0, %c0_1], %5 {strides = array<i32>} : memref<8x64xf32, #tpu.memory_space<vmem>>, vector<1x64xf32>,
    %c1_i32 = arith.constant 1 : i32
    %7 = arith.addi %0, %c1_i32 : i32
    %8 = arith.index_cast %7 : i32 to index
    %9 = memref.load %arg1[%8] : memref<16xi32, #tpu.memory_space<smem>>
    %10 = arith.index_cast %9 : i32 to index
    %c0_2 = arith.constant 0 : index
    %11 = vector.load %arg2[%10, %c0_2] : memref<256x64xf32, #tpu.memory_space<vmem>>, vector<1x64xf32>
    %c1 = arith.constant 1 : index
    %c0_3 = arith.constant 0 : index
    %12 = vector.load %arg6[%c1, %c0_3] : memref<8x64xf32, #tpu.memory_space<vmem>>, vector<1x64xf32>
    tpu.vector_store %arg6[%c1, %c0_3], %11 {strides = array<i32>} : memref<8x64xf32, #tpu.memory_space<vmem>>, vector<1x64xf32>,
    %c2_i32 = arith.constant 2 : i32
    %13 = arith.addi %0, %c2_i32 : i32
    %14 = arith.index_cast %13 : i32 to index
    %15 = memref.load %arg1[%14] : memref<16xi32, #tpu.memory_space<smem>>
    %16 = arith.index_cast %15 : i32 to index
    %c0_4 = arith.constant 0 : index
    %17 = vector.load %arg2[%16, %c0_4] : memref<256x64xf32, #tpu.memory_space<vmem>>, vector<1x64xf32>
    %c2 = arith.constant 2 : index
    %c0_5 = arith.constant 0 : index
    %18 = vector.load %arg6[%c2, %c0_5] : memref<8x64xf32, #tpu.memory_space<vmem>>, vector<1x64xf32>
    tpu.vector_store %arg6[%c2, %c0_5], %17 {strides = array<i32>} : memref<8x64xf32, #tpu.memory_space<vmem>>, vector<1x64xf32>,
    %c3_i32 = arith.constant 3 : i32
    %19 = arith.addi %0, %c3_i32 : i32
    %20 = arith.index_cast %19 : i32 to index
    %21 = memref.load %arg1[%20] : memref<16xi32, #tpu.memory_space<smem>>
    %22 = arith.index_cast %21 : i32 to index
    %c0_6 = arith.constant 0 : index
    %23 = vector.load %arg2[%22, %c0_6] : memref<256x64xf32, #tpu.memory_space<vmem>>, vector<1x64xf32>
    %c3 = arith.constant 3 : index
    %c0_7 = arith.constant 0 : index
    %24 = vector.load %arg6[%c3, %c0_7] : memref<8x64xf32, #tpu.memory_space<vmem>>, vector<1x64xf32>
    tpu.vector_store %arg6[%c3, %c0_7], %23 {strides = array<i32>} : memref<8x64xf32, #tpu.memory_space<vmem>>, vector<1x64xf32>,
    %c4_i32 = arith.constant 4 : i32
    %25 = arith.addi %0, %c4_i32 : i32
    %26 = arith.index_cast %25 : i32 to index
    %27 = memref.load %arg1[%26] : memref<16xi32, #tpu.memory_space<smem>>
    %28 = arith.index_cast %27 : i32 to index
    %c0_8 = arith.constant 0 : index
    %29 = vector.load %arg2[%28, %c0_8] : memref<256x64xf32, #tpu.memory_space<vmem>>, vector<1x64xf32>
    %c4 = arith.constant 4 : index
    %c0_9 = arith.constant 0 : index
    %30 = vector.load %arg6[%c4, %c0_9] : memref<8x64xf32, #tpu.memory_space<vmem>>, vector<1x64xf32>
    tpu.vector_store %arg6[%c4, %c0_9], %29 {strides = array<i32>} : memref<8x64xf32, #tpu.memory_space<vmem>>, vector<1x64xf32>,
    %c5_i32 = arith.constant 5 : i32
    %31 = arith.addi %0, %c5_i32 : i32
    %32 = arith.index_cast %31 : i32 to index
    %33 = memref.load %arg1[%32] : memref<16xi32, #tpu.memory_space<smem>>
    %34 = arith.index_cast %33 : i32 to index
    %c0_10 = arith.constant 0 : index
    %35 = vector.load %arg2[%34, %c0_10] : memref<256x64xf32, #tpu.memory_space<vmem>>, vector<1x64xf32>
    %c5 = arith.constant 5 : index
    %c0_11 = arith.constant 0 : index
    %36 = vector.load %arg6[%c5, %c0_11] : memref<8x64xf32, #tpu.memory_space<vmem>>, vector<1x64xf32>
    tpu.vector_store %arg6[%c5, %c0_11], %35 {strides = array<i32>} : memref<8x64xf32, #tpu.memory_space<vmem>>, vector<1x64xf32>,
    %c6_i32 = arith.constant 6 : i32
    %37 = arith.addi %0, %c6_i32 : i32
    %38 = arith.index_cast %37 : i32 to index
    %39 = memref.load %arg1[%38] : memref<16xi32, #tpu.memory_space<smem>>
    %40 = arith.index_cast %39 : i32 to index
    %c0_12 = arith.constant 0 : index
    %41 = vector.load %arg2[%40, %c0_12] : memref<256x64xf32, #tpu.memory_space<vmem>>, vector<1x64xf32>
    %c6 = arith.constant 6 : index
    %c0_13 = arith.constant 0 : index
    %42 = vector.load %arg6[%c6, %c0_13] : memref<8x64xf32, #tpu.memory_space<vmem>>, vector<1x64xf32>
    tpu.vector_store %arg6[%c6, %c0_13], %41 {strides = array<i32>} : memref<8x64xf32, #tpu.memory_space<vmem>>, vector<1x64xf32>,
    %c7_i32 = arith.constant 7 : i32
    %43 = arith.addi %0, %c7_i32 : i32
    %44 = arith.index_cast %43 : i32 to index
    %45 = memref.load %arg1[%44] : memref<16xi32, #tpu.memory_space<smem>>
    %46 = arith.index_cast %45 : i32 to index
    %c0_14 = arith.constant 0 : index
    %47 = vector.load %arg2[%46, %c0_14] : memref<256x64xf32, #tpu.memory_space<vmem>>, vector<1x64xf32>
    %c7 = arith.constant 7 : index
    %c0_15 = arith.constant 0 : index
    %48 = vector.load %arg6[%c7, %c0_15] : memref<8x64xf32, #tpu.memory_space<vmem>>, vector<1x64xf32>
    tpu.vector_store %arg6[%c7, %c0_15], %47 {strides = array<i32>} : memref<8x64xf32, #tpu.memory_space<vmem>>, vector<1x64xf32>,
    %c0_16 = arith.constant 0 : index
    %c0_17 = arith.constant 0 : index
    %49 = vector.load %arg6[%c0_16, %c0_17] : memref<8x64xf32, #tpu.memory_space<vmem>>, vector<8x64xf32>
    %c0_18 = arith.constant 0 : index
    %c0_19 = arith.constant 0 : index
    %50 = vector.load %arg3[%c0_18, %c0_19] : memref<64x128xf32, #tpu.memory_space<vmem>>, vector<64x128xf32>
    %cst = arith.constant dense<0.000000e+00> : vector<8x128xf32>
    %51 = tpu.matmul %49, %50, %cst {dimension_numbers = #tpu.dot_dimension_numbers<[1], [0], [0], [1], [0, 0, 1, 1], [], []>} : vector<8x64xf32>, vector<64x128xf32>, vector<8x128xf32> -> vector<8x128xf32>
    %c0_20 = arith.constant 0 : index
    %c0_21 = arith.constant 0 : index
    %52 = vector.load %arg4[%c0_20, %c0_21] : memref<1x128xf32, #tpu.memory_space<vmem>>, vector<1x128xf32>
    %53 = vector.broadcast %52 : vector<1x128xf32> to vector<8x128xf32>
    %54 = arith.addf %51, %53 : vector<8x128xf32>
    %c0_22 = arith.constant 0 : index
    %c0_23 = arith.constant 0 : index
    %55 = vector.load %arg5[%c0_22, %c0_23] : memref<8x128xf32, #tpu.memory_space<vmem>>, vector<8x128xf32>
    tpu.vector_store %arg5[%c0_22, %c0_23], %54 {strides = array<i32>} : memref<8x128xf32, #tpu.memory_space<vmem>>, vector<8x128xf32>,
    return
  }
  func.func @transform_0(%arg0: i32, %arg1: memref<16xi32, #tpu.memory_space<smem>>) -> (i32, i32) {
    %c0_i32 = arith.constant 0 : i32
    %c0_i32_0 = arith.constant 0 : i32
    %c0_i32_1 = arith.constant 0 : i32
    return %c0_i32, %c0_i32_0 : i32, i32
  }
  func.func @transform_1(%arg0: i32, %arg1: memref<16xi32, #tpu.memory_space<smem>>) -> (i32, i32) {
    %c0_i32 = arith.constant 0 : i32
    %c0_i32_0 = arith.constant 0 : i32
    %c0_i32_1 = arith.constant 0 : i32
    return %c0_i32, %c0_i32_0 : i32, i32
  }
  func.func @transform_2(%arg0: i32, %arg1: memref<16xi32, #tpu.memory_space<smem>>) -> (i32, i32) {
    %c0_i32 = arith.constant 0 : i32
    %c0_i32_0 = arith.constant 0 : i32
    %c0_i32_1 = arith.constant 0 : i32
    return %c0_i32, %c0_i32_0 : i32, i32
  }
  func.func @transform_3(%arg0: i32, %arg1: memref<16xi32, #tpu.memory_space<smem>>) -> (i32, i32) {
    %c0_i32 = arith.constant 0 : i32
    %c0_i32_0 = arith.constant 0 : i32
    return %arg0, %c0_i32 : i32, i32
  }
}

</mosaic_0001>

<bundles_post_ra>
// kernel: tpu_custom_call.1
= control target key start
LH: loop header
LB: loop body
LE: loop exit
PB: predicated region body
PF: predicated region fallthrough
CT: control target
= control target key end

     0   :  { %s437_s18 = smov [#allocation4]   ;;  %s612_s0 = inlined_call_operand.vmem [shape: s32[16], index: 0, kind: input, shape index: {}]   ;;  %s613_s1 = inlined_call_operand.vmem [shape: f32[256,64], index: 1, kind: input, shape index: {}]   ;;  %s614_s2 = inlined_call_operand.vmem [shape: f32[64,128], index: 2, kind: input, shape index: {}]   ;;  %s615_s3 = inlined_call_operand.vmem [shape: f32[1,128], index: 3, kind: input, shape index: {}]   ;;  %s616_s4 = inlined_call_operand.hbm [shape: f32[16,128], index: 4, kind: output, shape index: {}]  }
   0x1   :  { %s10_s17 = sshll.u32 %s612_s0, 4  ;;  %s11_s17 = int_to_ptr.vmem [resolvable:$true] %s10_s17 }
   0x2   :  { %13 = dma.vmem_to_smem %s11_s17, 16, %s437_s18, [#allocation3] }
   0x3   :  { %415 = dma.done.wait [#allocation3], 16 }
   0x4   :  { %416 = vsyncadd [#allocation3], 4294967280 }
   0x5   :  { %16 = sfence }
   0x6   :  { %17 = vsyncpa [#allocation6], 0 }
   0x7   :  { %19 = vsyncpa [#allocation6 + $0x1], 0  ;;  %s466_s19 = smov 0   ;;  %s468_s20 = smov 0  }
   0x8   :  { %s470_s21 = smov 0   ;;  %s472_s22 = smov 0  }
   0x9 LB: > { %s307_s0 = sadd.s32 4294967295, %s435_s22   ;;  %s308_s23 = sadd.s32 4294967294, %s435_s22   ;;  %s435_s22 = sphi %s472_s22, %s624_s22   ;;  %s431_s21 = sphi %s470_s21, %s623_s21   ;;  %s427_s20 = sphi %s468_s20, %s622_s20   ;;  %s423_s19 = sphi %s466_s19, %s621_s19  }
   0xa   : > { %s489_s24 = sadd.s32 1, %s435_s22   ;;  %s95_s25 = sadd.s32 1, %s431_s21 }
   0xb   : > { %s92_s26 = ssub.s32 %s435_s22, %s489_s24  ;;  %p105_p0 = scmp.ne.s32.totalorder %s431_s21, %s427_s20 }
   0xc   : > { %p93_p1 = scmp.eq.s32.totalorder %s92_s26, 0  ;;  %p106_p2 = scmp.eq.s32.totalorder %s307_s0, 1 }
   0xd   : > { %p111_p3 = scmp.ne.s32.totalorder %s427_s20, %s423_s19  ;;  %p112_p4 = scmp.eq.s32.totalorder %s308_s23, 1 }
   0xe   : > { %s499_s27 = scalar_select %p93_p1, %s431_s21, %s95_s25  }
   0xf   : > { %p501_p5 = por %p106_p2, %p105_p0  ;;  %p505_p6 = por %p112_p4, %p111_p3 }
  0x10   : > { %617 = sst [smem:[#allocation9_spill]] %s499_s27  ;;  %p310_p7 = scmp.ge.s32.totalorder %s435_s22, 1 }
  0x11   : > { %p139_p8 = scmp.lt.s32.totalorder %s435_s22, 3 }
  0x13   : > { %p140_p9 = pnand %p310_p7, %p139_p8 }
  0x14   : > { %s517_s8 = sshll.u32 (!%p140_p9), %s307_s0, 3 }
  0x15   : > { %143 = sbr.rel (%p140_p9) target bundleno = 176 (0xb0), region = 32  ;;  %s159_s9 = sld [smem:[#allocation4 + %s517_s8]] (!%p140_p9) }
  0x16   : > { %s164_s10 = sadd.s32 (!%p140_p9), 1, %s517_s8  ;;  %s169_s14 = sadd.s32 (!%p140_p9), 2, %s517_s8 }
  0x17   : > { %s165_s13 = sld [smem:[#allocation4 + %s164_s10]] (!%p140_p9)  ;;  %s174_s16 = sadd.s32 (!%p140_p9), 3, %s517_s8 }
  0x18   : > { %s170_s15 = sld [smem:[#allocation4 + %s169_s14]] (!%p140_p9)  ;;  %s179_s23 = sadd.s32 (!%p140_p9), 4, %s517_s8 }
  0x19   : > { %s175_s0 = sld [smem:[#allocation4 + %s174_s16]] (!%p140_p9)  ;;  %s184_s26 = sadd.s32 (!%p140_p9), 5, %s517_s8 }
  0x1a   : > { %v207_v0 = vld [vmem:[%s614_s2 + $0x38] sm:$0xff]  ;;  %v206_v1 = vld [vmem:[%s614_s2 + $0x30] sm:$0xff]  ;;  %v205_v2 = vld [vmem:[%s614_s2 + $0x28] sm:$0xff]  ;;  %s180_s25 = sld [smem:[#allocation4 + %s179_s23]]  ;;  %vm162_vm0 = vcmask 516096   ;;  %s189_s7 = sadd.s32 6, %s517_s8 }
  0x1b   : > { %224 = vmatpush.msra.mxu0 %v207_v0  ;;  %v204_v3 = vld [vmem:[%s614_s2 + $0x20] sm:$0xff]  ;;  %v203_v4 = vld [vmem:[%s614_s2 + $0x18] sm:$0xff]  ;;  %s185_s6 = sld [smem:[#allocation4 + %s184_s26]]  ;;  %s160_s12 = scalar_lea.vmem %s613_s1, %s159_s9  ;;  %v202_v5 = vld [vmem:[%s614_s2 + $0x10] sm:$0xff]  ;;  %vm212_vm1 = vcmask 523264  }
  0x1c   : > { %s190_s14 = sld [smem:[#allocation4 + %s189_s7]]  ;;  %v161_v6 = vld [vmem:[%s160_s12] sm:$0x1]  ;;  %s194_s30 = sadd.s32 7, %s517_s8  ;;  %v201_v8 = vld [vmem:[%s614_s2 + $0x8] sm:$0xff] }
  0x1d   : > { %225 = vmatpush.msra.mxu0 %v206_v1  ;;  %s166_s27 = scalar_lea.vmem %s613_s1, %s165_s13  ;;  %163 = vst.msk [vmem:[#allocation2] sm:$0x1] %vm162_vm0, %v161_v6  ;;  %s195_s9 = sld [smem:[#allocation4 + %s194_s30]]  ;;  %v200_v11 = vld [vmem:[%s614_s2] sm:$0xff] }
  0x1e   : > { %v167_v7 = vld [vmem:[%s166_s27] sm:$0x1]  ;;  %s171_s10 = scalar_lea.vmem %s613_s1, %s170_s15  ;;  %s248_s27 = scalar_lea.hbm %s616_s4, %s517_s8 }
  0x1f   : > { %226 = vmatpush.msra.mxu0 %v205_v2  ;;  %168 = vst.msk [vmem:[#allocation2 + $0x1] sm:$0x1] %vm162_vm0, %v167_v7  ;;  %v172_v9 = vld [vmem:[%s171_s10] sm:$0x1]  ;;  %s176_s13 = scalar_lea.vmem %s613_s1, %s175_s0  ;;  %s391_s10 = scalar_lea.hbm %s616_s4, 16 }
  0x20   : > { %173 = vst.msk [vmem:[#allocation2 + $0x2] sm:$0x1] %vm162_vm0, %v172_v9  ;;  %v177_v10 = vld [vmem:[%s176_s13] sm:$0x1]  ;;  %s181_s15 = scalar_lea.vmem %s613_s1, %s180_s25 }
  0x21   : > { %227 = vmatpush.msra.mxu0 %v204_v3  ;;  %178 = vst.msk [vmem:[#allocation2 + $0x3] sm:$0x1] %vm162_vm0, %v177_v10  ;;  %v182_v12 = vld [vmem:[%s181_s15] sm:$0x1]  ;;  %s186_s0 = scalar_lea.vmem %s613_s1, %s185_s6  ;;  %s155_s6 = sand.u32 1, %s427_s20  }
  0x22   : > { %183 = vst.msk [vmem:[#allocation2 + $0x4] sm:$0x1] %vm162_vm0, %v182_v12  ;;  %v187_v13 = vld [vmem:[%s186_s0] sm:$0x1]  ;;  %s191_s25 = scalar_lea.vmem %s613_s1, %s190_s14  ;;  %s311_s17 = sshll.u32 %s155_s6, 3 }
  0x23   : > { %228 = vmatpush.msra.mxu0 %v203_v4  ;;  %188 = vst.msk [vmem:[#allocation2 + $0x5] sm:$0x1] %vm162_vm0, %v187_v13  ;;  %v192_v14 = vld [vmem:[%s191_s25] sm:$0x1]  ;;  %s196_s12 = scalar_lea.vmem %s613_s1, %s195_s9  ;;  %s157_s16 = scalar_lea.vmem [#allocation5], %s311_s17 }
  0x24   : > { %193 = vst.msk [vmem:[#allocation2 + $0x6] sm:$0x1] %vm162_vm0, %v192_v14  ;;  %v197_v15 = vld [vmem:[%s196_s12] sm:$0x1]  ;;  %s250_s23 = sshll.u32 %s157_s16, 4  ;;  %s252_s9 = sshll.u32 %s248_s27, 4  ;;  %s251_s23 = int_to_ptr.vmem [resolvable:$true] %s250_s23  ;;  %s253_s9 = int_to_ptr.hbm [resolvable:$true] %s252_s9 }
  0x25   : > { %229 = vmatpush.msra.mxu0 %v202_v5  ;;  %198 = vst.msk [vmem:[#allocation2 + $0x7] sm:$0x1] %vm162_vm0, %v197_v15  ;;  %v358_v17 = vld [vmem:[%s615_s3] ss:$0 sm:$0xff]  ;;  %s238_s30 = scalar_lea.sflag [#allocation6], %s155_s6  ;;  %s385_s26 = sshra.s32 %s253_s9, 4  ;;  %s386_s26 = int_to_ptr.hbm [resolvable:$true] %s385_s26 }
  0x26   : > { %s387_s0 = scalar_lea.hbm %s386_s26, 8  ;;  %p392_p13 = scmp.lt.s32.totalorder %s386_s26, %s616_s4 }
  0x27   : > { %230 = vmatpush.msra.mxu0 %v201_v8  ;;  %p388_p10 = scmp.ne.s32.totalorder %s386_s26, %s387_s0  ;;  %p393_p0 = scmp.lt.s32.totalorder %s391_s10, %s387_s0 }
  0x29   : > { %231 = vmatpush.msra.mxu0 %v200_v11  ;;  %p389_p11 = pnand %p388_p10, %p501_p5  ;;  %p394_p1 = por %p393_p0, %p392_p13 }
  0x2b   : > { %p390_p12 = pneg %p389_p11 }
  0x2c   : > { %v199_v16 = vld [vmem:[#allocation2] sm:$0xff] }
  0x2d   : > { %313 = vmatmul.msk.f32.vlgmr.msra.gmra.mxu0 %vm212_vm1, %v199_v16  ;;  %p395_p2 = pnand %p394_p1, %p390_p12 }
  0xaa   : > { %v233_v18 = vpop.f32.mrf.mxu0 }
  0xab   : > { %v234_v19 = vadd.f32 %v358_v17, %v233_v18 }
  0xad   : > { %236 = vst [vmem:[%s157_s16] sm:$0xff] %v234_v19 }
  0xae   : > { %398 = shalt.err (!%p395_p2)
}
  0xaf   : > { %318 = dma.vmem_to_hbm [thread:$0]  (%p501_p5), %s251_s23, 128, %s253_s9, %s238_s30  }
  0xb0 PF: > { %p324_p3 = scmp.ge.s32.totalorder %s435_s22, 2  ;;  %s264_s11 = sand.u32 1, %s423_s19  }
  0xb1   : > { %s265_s12 = scalar_lea.sflag [#allocation6], %s264_s11 }
  0xb2   : > { %p321_p4 = pnand %p324_p3, %p505_p6 }
  0xb4   : > { %p322_p7 = pneg %p321_p4 }
  0xb6   : > { %418 = dma.done.wait (%p322_p7), %s265_s12, 128  }
  0xb7   : > { %420 = vsyncadd (%p322_p7), %s265_s12, 4294967168  ;;  %s620_s6 = sld [smem:[#allocation9_spill]]  ;;  %p22_p8 = scmp.ge.s32.totalorder %s489_s24, 4  }
  0xb8   : > { %s621_s19 = smov %s427_s20  ;;  %s622_s20 = smov %s431_s21 }
  0xb9   : > { %s624_s22 = smov %s489_s24  ;;  %24 = sbr.rel (!%p22_p8) target bundleno = 9 (0x9), region = 72 }
  0xbd   : > { %s623_s21 = smov %s620_s6 }
  0xbe   :  { %271 = vsyncpa [#allocation6], 1 }
  0xbf   :  { %273 = vsyncpa [#allocation6 + $0x1], 1 }

</bundles_post_ra>
